<compile_context>
chip_gen: v6e
topology: v6e:2x2x1
jax: 0.10.0
libtpu: 0.0.40
codegen_flags: <defaults>
</compile_context>

<pallas_src>
import functools

import jax
import jax.numpy as jnp
from jax import lax
from jax.experimental import pallas as pl
from jax.experimental.pallas import tpu as pltpu


# ----------------------------- fused Pallas kernel ------------------------------

def fused_cnn_kernel(x_ref, w1_ref, b1_ref, w2_ref, b2_ref,
                     wfc1_ref, bfc1_ref, wfc2_ref, bfc2_ref,
                     out_ref, *, L, Bb):
    """Whole CNNACP forward for one batch block.

    Layout invariant: activations are (C, L*Bb) with lane index = l*Bb + b (batch on
    lanes).  Pool outputs stay dilated: pool1 is valid only at even-l lanes, pool2
    only at l % 4 == 0 lanes; the remaining lanes hold garbage and are never read
    (requires L % 4 == 0, asserted in the wrapper).
    """
    f32 = jnp.float32
    N = L * Bb
    x = x_ref[0]                                                      # (C_pad, N)

    def shl(a, k):   # out[:, i] = a[:, i + k]; zeros in the last k lanes
        return jnp.concatenate([a[:, k:], jnp.zeros((a.shape[0], k), f32)], axis=1)

    def shr(a, k):   # out[:, i] = a[:, i - k]; zeros in the first k lanes
        return jnp.concatenate([jnp.zeros((a.shape[0], k), f32), a[:, :N - k]], axis=1)

    # ---- conv1 (k=3, padding=1): 3 taps folded into one MXU matmul ----
    xcat = jnp.concatenate([shr(x, Bb), x, shl(x, Bb)], axis=0)       # (3*C_pad, N)
    y = jnp.dot(w1_ref[...], xcat, preferred_element_type=f32) + b1_ref[...]
    y = jnp.maximum(y, 0.0)                                           # (16, N)

    # ---- maxpool1 (k=2): pooled value lands at even-l lanes ----
    m1 = jnp.maximum(y, shl(y, Bb))                                   # (16, N)

    # ---- conv2 (k=3, padding=1) on the pooled (stride-2) sequence ----
    pcat = jnp.concatenate([shr(m1, 2 * Bb), m1, shl(m1, 2 * Bb)], axis=0)  # (48, N)
    z = jnp.dot(w2_ref[...], pcat, preferred_element_type=f32) + b2_ref[...]
    z = jnp.maximum(z, 0.0)                                           # (32, N), valid at l%2==0

    # ---- maxpool2 (k=2): pooled value lands at lanes with l % 4 == 0 ----
    m2 = jnp.maximum(z, shl(z, 2 * Bb))                               # (32, N)

    # ---- flatten + fc1: stack the Lq valid lane blocks on sublanes, one matmul ----
    Lq = L // 4
    fcat = jnp.concatenate(
        [m2[:, 4 * s * Bb:(4 * s + 1) * Bb] for s in range(Lq)], axis=0)   # (32*Lq, Bb)
    h = jnp.dot(wfc1_ref[...], fcat, preferred_element_type=f32) + bfc1_ref[...]
    h = jnp.maximum(h, 0.0)                                           # (64, Bb)

    # ---- fc2 + sigmoid, lane-dense (1, Bb) store ----
    o = jnp.dot(wfc2_ref[...], h, preferred_element_type=f32) + bfc2_ref[...]
    out_ref[0] = 1.0 / (1.0 + jnp.exp(-o))                            # exp on EUP


# ------------------------------ host wrapper -------------------------------

@functools.partial(jax.jit, static_argnames=("block_b",))
def cnn_acp_forward(x, params, *, block_b=128):
    """x: (B, C_in, L) float32 — NCW, matching PyTorch Conv1d's NCL."""
    w1, b1, w2, b2, wfc1, bfc1, wfc2, bfc2 = params
    B, C_in, L = x.shape
    assert L % 4 == 0, "maxpool/flatten folding assumes sequence_length % 4 == 0"
    C1 = w1.shape[0]            # 16
    C2 = w2.shape[0]            # 32
    H = wfc1.shape[0]           # 64
    Lq = L // 4

    nblk = (B + block_b - 1) // block_b
    B_pad = nblk * block_b
    C_pad = ((C_in + 7) // 8) * 8

    # input relayout: (B, C_in, L) -> (nblk, C_pad, L*block_b), lane = l*block_b + b
    x_pad = jnp.pad(x, ((0, B_pad - B), (0, C_pad - C_in), (0, 0)))
    xk = x_pad.reshape(nblk, block_b, C_pad, L).transpose(0, 2, 3, 1)
    xk = xk.reshape(nblk, C_pad, L * block_b)

    # tap-folded conv weights (columns ordered tap-block then channel, matching xcat/pcat)
    w1_pad = jnp.pad(w1, ((0, 0), (0, C_pad - C_in), (0, 0)))
    w1cat = jnp.transpose(w1_pad, (0, 2, 1)).reshape(C1, 3 * C_pad)   # (16, 3*C_pad)
    w2cat = jnp.transpose(w2, (0, 2, 1)).reshape(C2, 3 * C1)          # (32, 48)

    # fc1 weight regrouped so column index = s*C2 + c matches fcat's row order
    wfc1g = wfc1.reshape(H, C2, Lq).transpose(0, 2, 1).reshape(H, C2 * Lq)

    b1c, b2c = b1[:, None], b2[:, None]
    bfc1c, bfc2c = bfc1[:, None], bfc2[:, None]

    def const_spec(a):
        nd = a.ndim
        return pl.BlockSpec(a.shape, lambda k, _nd=nd: (0,) * _nd)

    out3 = pl.pallas_call(
        functools.partial(fused_cnn_kernel, L=L, Bb=block_b),
        out_shape=jax.ShapeDtypeStruct((nblk, 1, block_b), jnp.float32),
        grid_spec=pltpu.PrefetchScalarGridSpec(
            num_scalar_prefetch=0,
            grid=(nblk,),
            in_specs=[
                pl.BlockSpec((1, C_pad, L * block_b), lambda k: (k, 0, 0)),  # x block
                const_spec(w1cat), const_spec(b1c),                          # conv1
                const_spec(w2cat), const_spec(b2c),                          # conv2
                const_spec(wfc1g), const_spec(bfc1c),                        # fc1
                const_spec(wfc2), const_spec(bfc2c),                         # fc2
            ],
            out_specs=pl.BlockSpec((1, 1, block_b), lambda k: (k, 0, 0)),
        ),
        compiler_params=pltpu.CompilerParams(dimension_semantics=("parallel",)),
    )(xk, w1cat, b1c, w2cat, b2c, wfc1g, bfc1c, wfc2, bfc2c)

    return out3.reshape(B_pad)[:B].reshape(B, 1)


# ------------------------------ reference (plain JAX) ------------------------------

def cnn_acp_reference(x, params):
    w1, b1, w2, b2, wfc1, bfc1, wfc2, bfc2 = params
    B = x.shape[0]
    dn = ("NCW", "OIW", "NCW")
    y = lax.conv_general_dilated(x, w1, window_strides=(1,), padding=[(1, 1)],
                                 dimension_numbers=dn) + b1[None, :, None]
    y = jnp.maximum(y, 0.0)
    y = y.reshape(B, 16, y.shape[-1] // 2, 2).max(axis=-1)
    z = lax.conv_general_dilated(y, w2, window_strides=(1,), padding=[(1, 1)],
                                 dimension_numbers=dn) + b2[None, :, None]
    z = jnp.maximum(z, 0.0)
    z = z.reshape(B, 32, z.shape[-1] // 2, 2).max(axis=-1)
    f = z.reshape(B, -1)
    h = jnp.maximum(f @ wfc1.T + bfc1, 0.0)
    return jax.nn.sigmoid(h @ wfc2.T + bfc2)


# ----------------------------------- main -----------------------------------

if __name__ == "__main__":
    B, C_IN, SEQ = 2, 4, 16
    FLAT = 32 * (SEQ // 4)

    key = jax.random.PRNGKey(0)
    ks = jax.random.split(key, 9)
    params = (
        jax.random.normal(ks[0], (16, C_IN, 3), jnp.float32) * 0.1,   # conv1.weight
        jax.random.normal(ks[1], (16,), jnp.float32) * 0.1,           # conv1.bias
        jax.random.normal(ks[2], (32, 16, 3), jnp.float32) * 0.1,     # conv2.weight
        jax.random.normal(ks[3], (32,), jnp.float32) * 0.1,           # conv2.bias
        jax.random.normal(ks[4], (64, FLAT), jnp.float32) * 0.1,      # fc1.weight
        jax.random.normal(ks[5], (64,), jnp.float32) * 0.1,           # fc1.bias
        jax.random.normal(ks[6], (1, 64), jnp.float32) * 0.1,         # fc2.weight
        jax.random.normal(ks[7], (1,), jnp.float32) * 0.1,            # fc2.bias
    )
    x = jax.random.normal(ks[8], (B, C_IN, SEQ), jnp.float32)

    out = jax.block_until_ready(cnn_acp_forward(x, params))
    ref = jax.block_until_ready(cnn_acp_reference(x, params))
    assert out.shape == (B, 1)
    assert bool(jnp.allclose(out, ref, atol=1e-3, rtol=1e-3)), (out, ref)
    print("KERNEL_OK")
</pallas_src>

<mosaic_0001>
module attributes {stable_mosaic.version = 11 : i64} {
  func.func @fused_cnn_kernel(%arg0: i32, %arg1: memref<1x8x2048xf32, #tpu.memory_space<vmem>>, %arg2: memref<16x24xf32, #tpu.memory_space<vmem>>, %arg3: memref<16x1xf32, #tpu.memory_space<vmem>>, %arg4: memref<32x48xf32, #tpu.memory_space<vmem>>, %arg5: memref<32x1xf32, #tpu.memory_space<vmem>>, %arg6: memref<64x128xf32, #tpu.memory_space<vmem>>, %arg7: memref<64x1xf32, #tpu.memory_space<vmem>>, %arg8: memref<1x64xf32, #tpu.memory_space<vmem>>, %arg9: memref<1x1xf32, #tpu.memory_space<vmem>>, %arg10: memref<1x1x128xf32, #tpu.memory_space<vmem>>) attributes {dimension_semantics = [#tpu.dimension_semantics<parallel>], iteration_bounds = array<i64: 1>, scalar_prefetch = 0 : i64, scratch_operands = 0 : i64, tpu.core_type = #tpu.core_type<tc>, window_params = [{transform_indices = @transform_0, window_bounds = array<i64: 1, 8, 2048>}, {pipeline_mode = #tpu.pipeline_mode<synchronous>, transform_indices = @transform_1, window_bounds = array<i64: 16, 24>}, {pipeline_mode = #tpu.pipeline_mode<synchronous>, transform_indices = @transform_2, window_bounds = array<i64: 16, 1>}, {pipeline_mode = #tpu.pipeline_mode<synchronous>, transform_indices = @transform_3, window_bounds = array<i64: 32, 48>}, {pipeline_mode = #tpu.pipeline_mode<synchronous>, transform_indices = @transform_4, window_bounds = array<i64: 32, 1>}, {pipeline_mode = #tpu.pipeline_mode<synchronous>, transform_indices = @transform_5, window_bounds = array<i64: 64, 128>}, {pipeline_mode = #tpu.pipeline_mode<synchronous>, transform_indices = @transform_6, window_bounds = array<i64: 64, 1>}, {pipeline_mode = #tpu.pipeline_mode<synchronous>, transform_indices = @transform_7, window_bounds = array<i64: 1, 64>}, {pipeline_mode = #tpu.pipeline_mode<synchronous>, transform_indices = @transform_8, window_bounds = array<i64: 1, 1>}, {transform_indices = @transform_9, window_bounds = array<i64: 1, 1, 128>}]} {
    %c0 = arith.constant 0 : index
    %c0_0 = arith.constant 0 : index
    %c0_1 = arith.constant 0 : index
    %0 = vector.load %arg1[%c0, %c0_0, %c0_1] : memref<1x8x2048xf32, #tpu.memory_space<vmem>>, vector<1x8x2048xf32>
    %1 = vector.shape_cast %0 : vector<1x8x2048xf32> to vector<8x2048xf32>
    %cst = arith.constant 0.000000e+00 : f32
    %2 = vector.broadcast %cst : f32 to vector<8x128xf32>
    %3 = vector.extract_strided_slice %1 {offsets = [0, 0], sizes = [8, 1920], strides = [1, 1]} : vector<8x2048xf32> to vector<8x1920xf32>
    %4 = tpu.concatenate %2, %3 in 1 : vector<8x128xf32>, vector<8x1920xf32> -> vector<8x2048xf32>
    %5 = vector.extract_strided_slice %1 {offsets = [0, 128], sizes = [8, 1920], strides = [1, 1]} : vector<8x2048xf32> to vector<8x1920xf32>
    %cst_2 = arith.constant 0.000000e+00 : f32
    %6 = vector.broadcast %cst_2 : f32 to vector<8x128xf32>
    %7 = tpu.concatenate %5, %6 in 1 : vector<8x1920xf32>, vector<8x128xf32> -> vector<8x2048xf32>
    %8 = tpu.concatenate %4, %1, %7 in 0 : vector<8x2048xf32>, vector<8x2048xf32>, vector<8x2048xf32> -> vector<24x2048xf32>
    %c0_3 = arith.constant 0 : index
    %c0_4 = arith.constant 0 : index
    %9 = vector.load %arg2[%c0_3, %c0_4] : memref<16x24xf32, #tpu.memory_space<vmem>>, vector<16x24xf32>
    %cst_5 = arith.constant dense<0.000000e+00> : vector<16x2048xf32>
    %10 = tpu.matmul %9, %8, %cst_5 {dimension_numbers = #tpu.dot_dimension_numbers<[1], [0], [0], [1], [0, 0, 1, 1], [], []>} : vector<16x24xf32>, vector<24x2048xf32>, vector<16x2048xf32> -> vector<16x2048xf32>
    %c0_6 = arith.constant 0 : index
    %c0_7 = arith.constant 0 : index
    %11 = vector.load %arg3[%c0_6, %c0_7] : memref<16x1xf32, #tpu.memory_space<vmem>>, vector<16x1xf32>
    %12 = vector.broadcast %11 : vector<16x1xf32> to vector<16x2048xf32>
    %13 = arith.addf %10, %12 : vector<16x2048xf32>
    %cst_8 = arith.constant 0.000000e+00 : f32
    %14 = vector.broadcast %cst_8 : f32 to vector<16x2048xf32>
    %15 = arith.maximumf %13, %14 : vector<16x2048xf32>
    %16 = vector.extract_strided_slice %15 {offsets = [0, 128], sizes = [16, 1920], strides = [1, 1]} : vector<16x2048xf32> to vector<16x1920xf32>
    %cst_9 = arith.constant 0.000000e+00 : f32
    %17 = vector.broadcast %cst_9 : f32 to vector<16x128xf32>
    %18 = tpu.concatenate %16, %17 in 1 : vector<16x1920xf32>, vector<16x128xf32> -> vector<16x2048xf32>
    %19 = arith.maximumf %15, %18 : vector<16x2048xf32>
    %cst_10 = arith.constant 0.000000e+00 : f32
    %20 = vector.broadcast %cst_10 : f32 to vector<16x256xf32>
    %21 = vector.extract_strided_slice %19 {offsets = [0, 0], sizes = [16, 1792], strides = [1, 1]} : vector<16x2048xf32> to vector<16x1792xf32>
    %22 = tpu.concatenate %20, %21 in 1 : vector<16x256xf32>, vector<16x1792xf32> -> vector<16x2048xf32>
    %23 = vector.extract_strided_slice %19 {offsets = [0, 256], sizes = [16, 1792], strides = [1, 1]} : vector<16x2048xf32> to vector<16x1792xf32>
    %cst_11 = arith.constant 0.000000e+00 : f32
    %24 = vector.broadcast %cst_11 : f32 to vector<16x256xf32>
    %25 = tpu.concatenate %23, %24 in 1 : vector<16x1792xf32>, vector<16x256xf32> -> vector<16x2048xf32>
    %26 = tpu.concatenate %22, %19, %25 in 0 : vector<16x2048xf32>, vector<16x2048xf32>, vector<16x2048xf32> -> vector<48x2048xf32>
    %c0_12 = arith.constant 0 : index
    %c0_13 = arith.constant 0 : index
    %27 = vector.load %arg4[%c0_12, %c0_13] : memref<32x48xf32, #tpu.memory_space<vmem>>, vector<32x48xf32>
    %cst_14 = arith.constant dense<0.000000e+00> : vector<32x2048xf32>
    %28 = tpu.matmul %27, %26, %cst_14 {dimension_numbers = #tpu.dot_dimension_numbers<[1], [0], [0], [1], [0, 0, 1, 1], [], []>} : vector<32x48xf32>, vector<48x2048xf32>, vector<32x2048xf32> -> vector<32x2048xf32>
    %c0_15 = arith.constant 0 : index
    %c0_16 = arith.constant 0 : index
    %29 = vector.load %arg5[%c0_15, %c0_16] : memref<32x1xf32, #tpu.memory_space<vmem>>, vector<32x1xf32>
    %30 = vector.broadcast %29 : vector<32x1xf32> to vector<32x2048xf32>
    %31 = arith.addf %28, %30 : vector<32x2048xf32>
    %cst_17 = arith.constant 0.000000e+00 : f32
    %32 = vector.broadcast %cst_17 : f32 to vector<32x2048xf32>
    %33 = arith.maximumf %31, %32 : vector<32x2048xf32>
    %34 = vector.extract_strided_slice %33 {offsets = [0, 256], sizes = [32, 1792], strides = [1, 1]} : vector<32x2048xf32> to vector<32x1792xf32>
    %cst_18 = arith.constant 0.000000e+00 : f32
    %35 = vector.broadcast %cst_18 : f32 to vector<32x256xf32>
    %36 = tpu.concatenate %34, %35 in 1 : vector<32x1792xf32>, vector<32x256xf32> -> vector<32x2048xf32>
    %37 = arith.maximumf %33, %36 : vector<32x2048xf32>
    %38 = vector.extract_strided_slice %37 {offsets = [0, 0], sizes = [32, 128], strides = [1, 1]} : vector<32x2048xf32> to vector<32x128xf32>
    %39 = vector.extract_strided_slice %37 {offsets = [0, 512], sizes = [32, 128], strides = [1, 1]} : vector<32x2048xf32> to vector<32x128xf32>
    %40 = vector.extract_strided_slice %37 {offsets = [0, 1024], sizes = [32, 128], strides = [1, 1]} : vector<32x2048xf32> to vector<32x128xf32>
    %41 = vector.extract_strided_slice %37 {offsets = [0, 1536], sizes = [32, 128], strides = [1, 1]} : vector<32x2048xf32> to vector<32x128xf32>
    %42 = tpu.concatenate %38, %39, %40, %41 in 0 : vector<32x128xf32>, vector<32x128xf32>, vector<32x128xf32>, vector<32x128xf32> -> vector<128x128xf32>
    %c0_19 = arith.constant 0 : index
    %c0_20 = arith.constant 0 : index
    %43 = vector.load %arg6[%c0_19, %c0_20] : memref<64x128xf32, #tpu.memory_space<vmem>>, vector<64x128xf32>
    %cst_21 = arith.constant dense<0.000000e+00> : vector<64x128xf32>
    %44 = tpu.matmul %43, %42, %cst_21 {dimension_numbers = #tpu.dot_dimension_numbers<[1], [0], [0], [1], [0, 0, 1, 1], [], []>} : vector<64x128xf32>, vector<128x128xf32>, vector<64x128xf32> -> vector<64x128xf32>
    %c0_22 = arith.constant 0 : index
    %c0_23 = arith.constant 0 : index
    %45 = vector.load %arg7[%c0_22, %c0_23] : memref<64x1xf32, #tpu.memory_space<vmem>>, vector<64x1xf32>
    %46 = vector.broadcast %45 : vector<64x1xf32> to vector<64x128xf32>
    %47 = arith.addf %44, %46 : vector<64x128xf32>
    %cst_24 = arith.constant 0.000000e+00 : f32
    %48 = vector.broadcast %cst_24 : f32 to vector<64x128xf32>
    %49 = arith.maximumf %47, %48 : vector<64x128xf32>
    %c0_25 = arith.constant 0 : index
    %c0_26 = arith.constant 0 : index
    %50 = vector.load %arg8[%c0_25, %c0_26] : memref<1x64xf32, #tpu.memory_space<vmem>>, vector<1x64xf32>
    %cst_27 = arith.constant dense<0.000000e+00> : vector<1x128xf32>
    %51 = tpu.matmul %50, %49, %cst_27 {dimension_numbers = #tpu.dot_dimension_numbers<[1], [0], [0], [1], [0, 0, 1, 1], [], []>} : vector<1x64xf32>, vector<64x128xf32>, vector<1x128xf32> -> vector<1x128xf32>
    %c0_28 = arith.constant 0 : index
    %c0_29 = arith.constant 0 : index
    %52 = vector.load %arg9[%c0_28, %c0_29] : memref<1x1xf32, #tpu.memory_space<vmem>>, vector<1x1xf32>
    %53 = vector.broadcast %52 : vector<1x1xf32> to vector<1x128xf32>
    %54 = arith.addf %51, %53 : vector<1x128xf32>
    %cst_30 = arith.constant 0.000000e+00 : f32
    %55 = vector.broadcast %cst_30 : f32 to vector<1x128xf32>
    %56 = arith.subf %55, %54 : vector<1x128xf32>
    %57 = math.exp %56 : vector<1x128xf32>
    %cst_31 = arith.constant 1.000000e+00 : f32
    %58 = vector.broadcast %cst_31 : f32 to vector<1x128xf32>
    %59 = arith.addf %58, %57 : vector<1x128xf32>
    %cst_32 = arith.constant 1.000000e+00 : f32
    %60 = vector.broadcast %cst_32 : f32 to vector<1x128xf32>
    %61 = arith.divf %60, %59 : vector<1x128xf32>
    %c0_33 = arith.constant 0 : index
    %c0_34 = arith.constant 0 : index
    %c0_35 = arith.constant 0 : index
    %62 = vector.load %arg10[%c0_33, %c0_34, %c0_35] : memref<1x1x128xf32, #tpu.memory_space<vmem>>, vector<1x1x128xf32>
    %63 = vector.shape_cast %62 : vector<1x1x128xf32> to vector<1x128xf32>
    %64 = vector.shape_cast %61 : vector<1x128xf32> to vector<1x1x128xf32>
    tpu.vector_store %arg10[%c0_33, %c0_34, %c0_35], %64 {strides = array<i32>} : memref<1x1x128xf32, #tpu.memory_space<vmem>>, vector<1x1x128xf32>,
    return
  }
  func.func @transform_0(%arg0: i32) -> (i32, i32, i32) {
    %c0_i32 = arith.constant 0 : i32
    %c0_i32_0 = arith.constant 0 : i32
    %c0_i32_1 = arith.constant 0 : i32
    return %arg0, %c0_i32, %c0_i32_0 : i32, i32, i32
  }
  func.func @transform_1(%arg0: i32) -> (i32, i32) {
    %c0_i32 = arith.constant 0 : i32
    %c0_i32_0 = arith.constant 0 : i32
    %c0_i32_1 = arith.constant 0 : i32
    return %c0_i32, %c0_i32_0 : i32, i32
  }
  func.func @transform_2(%arg0: i32) -> (i32, i32) {
    %c0_i32 = arith.constant 0 : i32
    %c0_i32_0 = arith.constant 0 : i32
    %c0_i32_1 = arith.constant 0 : i32
    return %c0_i32, %c0_i32_0 : i32, i32
  }
  func.func @transform_3(%arg0: i32) -> (i32, i32) {
    %c0_i32 = arith.constant 0 : i32
    %c0_i32_0 = arith.constant 0 : i32
    %c0_i32_1 = arith.constant 0 : i32
    return %c0_i32, %c0_i32_0 : i32, i32
  }
  func.func @transform_4(%arg0: i32) -> (i32, i32) {
    %c0_i32 = arith.constant 0 : i32
    %c0_i32_0 = arith.constant 0 : i32
    %c0_i32_1 = arith.constant 0 : i32
    return %c0_i32, %c0_i32_0 : i32, i32
  }
  func.func @transform_5(%arg0: i32) -> (i32, i32) {
    %c0_i32 = arith.constant 0 : i32
    %c0_i32_0 = arith.constant 0 : i32
    %c0_i32_1 = arith.constant 0 : i32
    return %c0_i32, %c0_i32_0 : i32, i32
  }
  func.func @transform_6(%arg0: i32) -> (i32, i32) {
    %c0_i32 = arith.constant 0 : i32
    %c0_i32_0 = arith.constant 0 : i32
    %c0_i32_1 = arith.constant 0 : i32
    return %c0_i32, %c0_i32_0 : i32, i32
  }
  func.func @transform_7(%arg0: i32) -> (i32, i32) {
    %c0_i32 = arith.constant 0 : i32
    %c0_i32_0 = arith.constant 0 : i32
    %c0_i32_1 = arith.constant 0 : i32
    return %c0_i32, %c0_i32_0 : i32, i32
  }
  func.func @transform_8(%arg0: i32) -> (i32, i32) {
    %c0_i32 = arith.constant 0 : i32
    %c0_i32_0 = arith.constant 0 : i32
    %c0_i32_1 = arith.constant 0 : i32
    return %c0_i32, %c0_i32_0 : i32, i32
  }
  func.func @transform_9(%arg0: i32) -> (i32, i32, i32) {
    %c0_i32 = arith.constant 0 : i32
    %c0_i32_0 = arith.constant 0 : i32
    %c0_i32_1 = arith.constant 0 : i32
    return %arg0, %c0_i32, %c0_i32_0 : i32, i32, i32
  }
}

</mosaic_0001>

<bundles_post_ra>
// kernel: cnn_acp_forward.1
= control target key start
LH: loop header
LB: loop body
LE: loop exit
PB: predicated region body
PF: predicated region fallthrough
CT: control target
= control target key end

     0   :  { %v1939_v3 = vmov 0.0   ;;  %vm64_vm0 = vcmask 195584   ;;  %v1940_v21 = vmov 0   ;;  %vm779_vm1 = vcmask 392192   ;;  %s2598_s0 = inlined_call_operand.vmem [shape: f32[1,8,2048], index: 0, kind: input, shape index: {}]   ;;  %s2599_s8 = inlined_call_operand.<no memory space> [shape: f32[1,1], index: 8, kind: input, shape index: {}]   ;;  %s2600_s1 = inlined_call_operand.vmem [shape: f32[16,24], index: 1, kind: input, shape index: {}]   ;;  %s2601_s2 = inlined_call_operand.vmem [shape: f32[16,1], index: 2, kind: input, shape index: {}]   ;;  %s2602_s4 = inlined_call_operand.vmem [shape: f32[32,1], index: 4, kind: input, shape index: {}]   ;;  %s2603_s6 = inlined_call_operand.vmem [shape: f32[64,1], index: 6, kind: input, shape index: {}]   ;;  %s2604_s3 = inlined_call_operand.vmem [shape: f32[32,48], index: 3, kind: input, shape index: {}]   ;;  %s2605_s5 = inlined_call_operand.vmem [shape: f32[64,128], index: 5, kind: input, shape index: {}]   ;;  %s2606_s7 = inlined_call_operand.vmem [shape: f32[1,64], index: 7, kind: input, shape index: {}]   ;;  %s2607_s9 = inlined_call_operand.vmem [shape: f32[1,1,128], index: 9, kind: output, shape index: {}]  }
   0x1   :  { %v36_v0 = vld [vmem:[%s2598_s0 + $0x10] sm:$0xff]  ;;  %v38_v1 = vld [vmem:[%s2598_s0 + $0x20] sm:$0xff]  ;;  %v35_v2 = vld [vmem:[%s2598_s0 + $0x8] sm:$0xff]  ;;  %135 = vmatprep.mubr.f32.mxu0 %v1939_v3  ;;  %212 = vmatprep.mubr.f32.mxu1 %v1939_v3  ;;  %v14_v4 = vstv %s2599_s8  ;;  %vm1941_vm2 = vmmov 0   ;;  %vm1700_vm3 = vcmask 523264  }
   0x2   :  { %97 = vmatprep.subr.mxu0 %v36_v0  ;;  %174 = vmatprep.subr.mxu1 %v38_v1  ;;  %v37_v5 = vld [vmem:[%s2598_s0 + $0x18] sm:$0xff]  ;;  %v34_v6 = vld [vmem:[%s2598_s0] sm:$0xff]  ;;  %15 = vst [vmem:[#allocation2] sm:$0x1] %v14_v4  ;;  %v40_v8 = vld [vmem:[%s2598_s0 + $0x30] sm:$0xff] }
   0x3   :  { %98 = vmatpush1.msra.mxu0 %v35_v2  ;;  %175 = vmatpush1.msra.mxu1 %v37_v5  ;;  %v2015_v7 = vld [vmem:[%s2600_s1] sm:$0xff]  ;;  %v39_v10 = vld [vmem:[%s2598_s0 + $0x28] sm:$0xff]  ;;  %v41_v11 = vld [vmem:[%s2598_s0 + $0x38] sm:$0xff] }
   0x4   :  { %99 = vmatprep.subr.mxu0 %v35_v2  ;;  %176 = vmatprep.subr.mxu1 %v37_v5  ;;  %v42_v9 = vld [vmem:[%s2598_s0 + $0x40] sm:$0xff]  ;;  %v2037_v12 = vld [vmem:[%s2600_s1 + $0x8] sm:$0xff]  ;;  %v44_v13 = vld [vmem:[%s2598_s0 + $0x50] sm:$0xff] }
   0x5   :  { %100 = vmatpush1.msra.mxu0 %v34_v6  ;;  %177 = vmatpush1.msra.mxu1 %v36_v0  ;;  %v46_v14 = vld [vmem:[%s2598_s0 + $0x60] sm:$0xff]  ;;  %v43_v15 = vld [vmem:[%s2598_s0 + $0x48] sm:$0xff]  ;;  %v45_v16 = vld [vmem:[%s2598_s0 + $0x58] sm:$0xff] }
   0x6   :  { %101 = vmatprep.subr.mxu0 %v34_v6  ;;  %178 = vmatprep.subr.mxu1 %v36_v0  ;;  %v48_v17 = vld [vmem:[%s2598_s0 + $0x70] sm:$0xff]  ;;  %v47_v18 = vld [vmem:[%s2598_s0 + $0x68] sm:$0xff]  ;;  %v49_v19 = vld [vmem:[%s2598_s0 + $0x78] sm:$0xff] }
   0x7   :  { %102 = vmatpush1.msra.mxu0 %v1939_v3  ;;  %179 = vmatpush1.msra.mxu1 %v35_v2  ;;  %v53_v20 = vld [vmem:[%s2601_s2 + $0x8] sm:$0xff]  ;;  %v52_v22 = vld [vmem:[%s2601_s2] sm:$0xff]  ;;  %v1535_v24 = vld [vmem:[%s2603_s6 + $0x38] sm:$0xff] }
   0x8   :  { %1785 = vmatmul.mubr.msk.f32.vlgmr.msra.gmra.mxu0 %vm64_vm0, %v2015_v7  ;;  %1787 = vmatmul.mubr.msk.f32.vlgmr.msra.gmra.mxu1 %vm64_vm0, %v2015_v7  ;;  %v756_v23 = vld [vmem:[%s2602_s4 + $0x8] sm:$0xff]  ;;  %v1531_v26 = vld [vmem:[%s2603_s6 + $0x18] sm:$0xff]  ;;  %v757_v30 = vld [vmem:[%s2602_s4 + $0x10] sm:$0xff] }
   0x9   :  { %251 = vmatprep.subr.mxu0 %v40_v8  ;;  %328 = vmatprep.subr.mxu1 %v42_v9  ;;  %v1533_v25 = vld [vmem:[%s2603_s6 + $0x28] sm:$0xff]  ;;  %v1690_v28 = vld [vmem:[#allocation2] sm:$0x1]  ;;  %v758_v29 = vld [vmem:[%s2602_s4 + $0x18] sm:$0xff] }
   0xa   :  { %252 = vmatpush1.msra.mxu0 %v39_v10  ;;  %141 = vmatprep.mubr.f32.mxu0 %v1939_v3  ;;  %v1529_v27 = vld [vmem:[%s2603_s6 + $0x8] sm:$0xff]  ;;  %v755_v31 = vld [vmem:[%s2602_s4] sm:$0xff]  ;;  %v1534_v32 = vld [vmem:[%s2603_s6 + $0x30] sm:$0xff] }
   0xb   :  { %218 = vmatprep.mubr.f32.mxu1 %v1939_v3  ;;  %253 = vmatprep.subr.mxu0 %v39_v10  ;;  %v1532_v33 = vld [vmem:[%s2603_s6 + $0x20] sm:$0xff]  ;;  %v1530_v34 = vld [vmem:[%s2603_s6 + $0x10] sm:$0xff] }
   0xc   :  { %329 = vmatpush1.msra.mxu1 %v41_v11  ;;  %1786 = vmatmul.mubr.msk.f32.gmra.mxu0 %vm64_vm0, %v2037_v12  ;;  %v1528_v39 = vld [vmem:[%s2603_s6] sm:$0xff] }
   0xd   :  { %1788 = vmatmul.mubr.msk.f32.gmra.mxu1 %vm64_vm0, %v2037_v12  ;;  %254 = vmatpush1.msra.mxu0 %v38_v1 }
   0xe   :  { %330 = vmatprep.subr.mxu1 %v41_v11  ;;  %255 = vmatprep.subr.mxu0 %v38_v1 }
   0xf   :  { %331 = vmatpush1.msra.mxu1 %v40_v8  ;;  %256 = vmatpush1.msra.mxu0 %v37_v5 }
  0x10   :  { %332 = vmatprep.subr.mxu1 %v40_v8  ;;  %289 = vmatprep.mubr.f32.mxu0 %v1939_v3 }
  0x11   :  { %333 = vmatpush1.msra.mxu1 %v39_v10  ;;  %366 = vmatprep.mubr.f32.mxu1 %v1939_v3 }
  0x12   :  { %1789 = vmatmul.mubr.msk.f32.vlgmr.msra.gmra.mxu0 %vm64_vm0, %v2015_v7  ;;  %1791 = vmatmul.mubr.msk.f32.vlgmr.msra.gmra.mxu1 %vm64_vm0, %v2015_v7 }
  0x13   :  { %405 = vmatprep.subr.mxu0 %v44_v13  ;;  %482 = vmatprep.subr.mxu1 %v46_v14 }
  0x14   :  { %295 = vmatprep.mubr.f32.mxu0 %v1939_v3  ;;  %372 = vmatprep.mubr.f32.mxu1 %v1939_v3 }
  0x15   :  { %406 = vmatpush1.msra.mxu0 %v43_v15  ;;  %483 = vmatpush1.msra.mxu1 %v45_v16 }
  0x16   :  { %1790 = vmatmul.mubr.msk.f32.gmra.mxu0 %vm64_vm0, %v2037_v12  ;;  %1792 = vmatmul.mubr.msk.f32.gmra.mxu1 %vm64_vm0, %v2037_v12 }
  0x17   :  { %407 = vmatprep.subr.mxu0 %v43_v15  ;;  %484 = vmatprep.subr.mxu1 %v45_v16 }
  0x18   :  { %408 = vmatpush1.msra.mxu0 %v42_v9  ;;  %485 = vmatpush1.msra.mxu1 %v44_v13 }
  0x19   :  { %409 = vmatprep.subr.mxu0 %v42_v9  ;;  %486 = vmatprep.subr.mxu1 %v44_v13 }
  0x1a   :  { %410 = vmatpush1.msra.mxu0 %v41_v11  ;;  %443 = vmatprep.mubr.f32.mxu0 %v1939_v3 }
  0x1b   :  { %487 = vmatpush1.msra.mxu1 %v43_v15  ;;  %520 = vmatprep.mubr.f32.mxu1 %v1939_v3 }
  0x1c   :  { %1793 = vmatmul.mubr.msk.f32.vlgmr.msra.gmra.mxu0 %vm64_vm0, %v2015_v7  ;;  %1795 = vmatmul.mubr.msk.f32.vlgmr.msra.gmra.mxu1 %vm64_vm0, %v2015_v7 }
  0x1d   :  { %559 = vmatprep.subr.mxu0 %v48_v17  ;;  %636 = vmatprep.subr.mxu1 %v1939_v3 }
  0x1e   :  { %449 = vmatprep.mubr.f32.mxu0 %v1939_v3  ;;  %526 = vmatprep.mubr.f32.mxu1 %v1939_v3 }
  0x1f   :  { %560 = vmatpush1.msra.mxu0 %v47_v18  ;;  %637 = vmatpush1.msra.mxu1 %v49_v19 }
  0x20   :  { %1794 = vmatmul.mubr.msk.f32.gmra.mxu0 %vm64_vm0, %v2037_v12  ;;  %1796 = vmatmul.mubr.msk.f32.gmra.mxu1 %vm64_vm0, %v2037_v12 }
  0x21   :  { %561 = vmatprep.subr.mxu0 %v47_v18  ;;  %638 = vmatprep.subr.mxu1 %v49_v19 }
  0x22   :  { %562 = vmatpush1.msra.mxu0 %v46_v14  ;;  %639 = vmatpush1.msra.mxu1 %v48_v17 }
  0x23   :  { %563 = vmatprep.subr.mxu0 %v46_v14  ;;  %640 = vmatprep.subr.mxu1 %v48_v17 }
  0x24   :  { %564 = vmatpush1.msra.mxu0 %v45_v16  ;;  %597 = vmatprep.mubr.f32.mxu0 %v1939_v3 }
  0x25   :  { %641 = vmatpush1.msra.mxu1 %v47_v18  ;;  %674 = vmatprep.mubr.f32.mxu1 %v1939_v3 }
  0x26   :  { %1797 = vmatmul.mubr.msk.f32.vlgmr.msra.gmra.mxu0 %vm64_vm0, %v2015_v7  ;;  %1799 = vmatmul.mubr.msk.f32.vlgmr.msra.gmra.mxu1 %vm64_vm0, %v2015_v7 }
  0x27   :  { %603 = vmatprep.mubr.f32.mxu0 %v1939_v3  ;;  %680 = vmatprep.mubr.f32.mxu1 %v1939_v3 }
  0x28   :  { %1933 = vset.pattern.permute.xlu0 %v1940_v21  ;;  %1934 = vset.pattern.permute.xlu1 %v1940_v21 }
  0x29   :  { %61 = vperm.xlu0 %1933, %v53_v20   ;;  %776 = vperm.xlu1 %1934, %v758_v29  }
  0x2a   :  { %1798 = vmatmul.mubr.msk.f32.gmra.mxu0 %vm64_vm0, %v2037_v12  ;;  %1800 = vmatmul.mubr.msk.f32.gmra.mxu1 %vm64_vm0, %v2037_v12 }
  0x2b   :  { %856 = vmatprep.mubr.f32.mxu1 %v1939_v3  ;;  %1026 = vmatprep.mubr.f32.mxu0 %v1939_v3 }
  0x2d   :  { %56 = vperm.xlu0 %1933, %v52_v22   ;;  %771 = vperm.xlu1 %1934, %v757_v30  }
  0x31   :  { %766 = vperm.xlu0 %1933, %v756_v23   ;;  %761 = vperm.xlu1 %1934, %v755_v31  }
  0x35   :  { %1573 = vperm.xlu0 %1933, %v1535_v24   ;;  %1568 = vperm.xlu1 %1934, %v1534_v32  }
  0x39   :  { %1563 = vperm.xlu0 %1933, %v1533_v25   ;;  %1558 = vperm.xlu1 %1934, %v1532_v33  }
  0x3d   :  { %1553 = vperm.xlu0 %1933, %v1531_v26   ;;  %1548 = vperm.xlu1 %1934, %v1530_v34  }
  0x41   :  { %1543 = vperm.xlu0 %1933, %v1529_v27   ;;  %1538 = vperm.xlu1 %1934, %v1528_v39  }
  0x45   :  { %1693 = vperm.xlu0 %1933, %v1690_v28  }
  0xa4   :  { %v2147_v41 = vpop.permute.xlu0 %61 }
  0xa8   :  { %v2149_v47 = vpop.permute.xlu0 %56 }
  0xc8   :  { %v137_v35 = vpop.f32.mrf.mxu0  ;;  %v214_v36 = vpop.f32.mrf.mxu1 }
  0xc9   :  { %v215_v58 = vadd.f32 %v214_v36, %v2149_v47  ;;  %v138_v5 = vadd.f32 %v137_v35, %v2149_v47 }
  0xca   :  { %v139_v37 = vpop.f32.mrf.mxu0  ;;  %v216_v38 = vpop.f32.mrf.mxu1 }
  0xcb   :  { %v217_v52 = vadd.f32 %v216_v38, %v2149_v47  ;;  %v140_v61 = vadd.f32 %v139_v37, %v2149_v47  ;;  %v689_v8 = vmax.f32 %v215_v58, 0.0  ;;  %v687_v18 = vmax.f32 %v138_v5, 0.0 }
  0xcc   :  { %v143_v40 = vpop.f32.mrf.mxu0 }
  0xcd   :  { %v220_v42 = vpop.f32.mrf.mxu1  ;;  %v690_v1 = vmax.f32 %v217_v52, 0.0  ;;  %v144_v2 = vadd.f32 %v143_v40, %v2147_v41  ;;  %v688_v11 = vmax.f32 %v140_v61, 0.0 }
  0xce   :  { %v145_v43 = vpop.f32.mrf.mxu0  ;;  %v221_v53 = vadd.f32 %v220_v42, %v2147_v41 }
  0xcf   :  { %v222_v44 = vpop.f32.mrf.mxu1  ;;  %v146_v56 = vadd.f32 %v145_v43, %v2147_v41  ;;  %v2180_v14 = vmax.f32 %v689_v8, %v690_v1  ;;  %v703_v15 = vmax.f32 %v144_v2, 0.0  ;;  %v2199_v27 = vmax.f32 %v688_v11, %v689_v8  ;;  %v2294_v8 = vld [vmem:[%s2604_s3 + $0x10] sm:$0xff] }
  0xd0   :  { %v223_v48 = vadd.f32 %v222_v44, %v2147_v41  ;;  %v705_v4 = vmax.f32 %v221_v53, 0.0  ;;  %v2205_v30 = vmax.f32 %v687_v18, %v688_v11 }
  0xd1   :  { %v704_v6 = vmax.f32 %v146_v56, 0.0 }
  0xd2   :  { %v291_v45 = vpop.f32.mrf.mxu0  ;;  %v368_v46 = vpop.f32.mrf.mxu1  ;;  %v706_v59 = vmax.f32 %v223_v48, 0.0 }
  0xd3   :  { %v2153_v51 = vadd.f32 %v291_v45, %v2149_v47  ;;  %v2186_v19 = vmax.f32 %v704_v6, %v705_v4  ;;  %v369_v20 = vadd.f32 %v368_v46, %v2149_v47  ;;  %v2193_v22 = vmax.f32 %v703_v15, %v704_v6  ;;  %v2224_v46 = vld [vmem:[%s2604_s3] sm:$0xff] }
  0xd4   :  { %v293_v49 = vpop.f32.mrf.mxu0  ;;  %v370_v50 = vpop.f32.mrf.mxu1  ;;  %v2171_v9 = vmax.f32 %v705_v4, %v706_v59 }
  0xd5   :  { %v691_v62 = vmax.f32 %v2153_v51, 0.0  ;;  %v371_v23 = vadd.f32 %v370_v50, %v2149_v47  ;;  %v294_v31 = vadd.f32 %v293_v49, %v2149_v47  ;;  %v693_v36 = vmax.f32 %v369_v20, 0.0 }
  0xd6   :  { %v297_v54 = vpop.f32.mrf.mxu0  ;;  %v374_v55 = vpop.f32.mrf.mxu1 }
  0xd7   :  { %v2159_v57 = vadd.f32 %v297_v54, %v2147_v41  ;;  %v2175_v12 = vmax.f32 %v690_v1, %v691_v62  ;;  %v375_v24 = vadd.f32 %v374_v55, %v2147_v41  ;;  %v694_v37 = vmax.f32 %v371_v23, 0.0 }
  0xd8   :  { %v299_v60 = vpop.f32.mrf.mxu0  ;;  %v376_v0 = vpop.f32.mrf.mxu1  ;;  %v692_v43 = vmax.f32 %v294_v31, 0.0 }
  0xd9   :  { %v707_v63 = vmax.f32 %v2159_v57, 0.0  ;;  %v377_v16 = vadd.f32 %v376_v0, %v2147_v41  ;;  %v300_v25 = vadd.f32 %v299_v60, %v2147_v41  ;;  %v709_v38 = vmax.f32 %v375_v24, 0.0  ;;  %v2266_v60 = vld [vmem:[%s2604_s3 + $0x8] sm:$0xff] }
  0xda   :  { %v2232_v49 = vmax.f32 %v693_v36, %v694_v37  ;;  %v2247_v55 = vmax.f32 %v692_v43, %v693_v36  ;;  %v2258_v57 = vmax.f32 %v691_v62, %v692_v43 }
  0xdb   :  { %v2169_v7 = vmax.f32 %v706_v59, %v707_v63  ;;  %v710_v32 = vmax.f32 %v377_v16, 0.0  ;;  %v708_v39 = vmax.f32 %v300_v25, 0.0 }
  0xdc   :  { %v445_v10 = vpop.f32.mrf.mxu0  ;;  %v2177_v13 = vpop.f32.mrf.mxu1 }
  0xdd   :  { %812 = vmatprep.subr.mxu1 %v2169_v7  ;;  %v2190_v21 = vadd.f32 %v445_v10, %v2149_v47  ;;  %v2218_v44 = vmax.f32 %v709_v38, %v710_v32  ;;  %v2234_v50 = vmax.f32 %v708_v39, %v709_v38  ;;  %v2242_v53 = vmax.f32 %v707_v63, %v708_v39 }
  0xde   :  { %v2183_v17 = vpop.f32.mrf.mxu0  ;;  %813 = vmatpush1.msra.mxu1 %v2171_v9  ;;  %v524_v28 = vpop.f32.mrf.mxu1  ;;  %v523_v2 = vadd.f32 %v2177_v13, %v2149_v47 }
  0xdf   :  { %814 = vmatprep.subr.mxu1 %v2175_v12  ;;  %v695_v34 = vmax.f32 %v2190_v21, 0.0  ;;  %v525_v62 = vadd.f32 %v524_v28, %v2149_v47  ;;  %v448_v10 = vadd.f32 %v2183_v17, %v2149_v47 }
  0xe0   :  { %v451_v26 = vpop.f32.mrf.mxu0  ;;  %815 = vmatpush1.msra.mxu1 %v2180_v14  ;;  %v528_v42 = vpop.f32.mrf.mxu1 }
  0xe1   :  { %v2202_v29 = vadd.f32 %v451_v26, %v2147_v41  ;;  %816 = vmatprep.subr.mxu1 %v2186_v19  ;;  %v2228_v48 = vmax.f32 %v694_v37, %v695_v34  ;;  %v529_v51 = vadd.f32 %v528_v42, %v2147_v41  ;;  %v698_v11 = vmax.f32 %v525_v62, 0.0 }
  0xe2   :  { %v453_v33 = vpop.f32.mrf.mxu0  ;;  %817 = vmatpush1.msra.mxu1 %v2193_v22  ;;  %v530_v54 = vpop.f32.mrf.mxu1 }
  0xe3   :  { %v711_v35 = vmax.f32 %v2202_v29, 0.0  ;;  %818 = vmatprep.subr.mxu1 %v2199_v27  ;;  %v531_v59 = vadd.f32 %v530_v54, %v2147_v41  ;;  %v454_v4 = vadd.f32 %v453_v33, %v2147_v41 }
  0xe4   :  { %819 = vmatpush1.msra.mxu1 %v2205_v30 }
  0xe5   :  { %v2215_v40 = vmax.f32 %v710_v32, %v711_v35  ;;  %820 = vmatprep.subr.mxu1 %v1939_v3  ;;  %v714_v1 = vmax.f32 %v531_v59, 0.0  ;;  %v712_v15 = vmax.f32 %v454_v4, 0.0 }
  0xe6   :  { %v599_v45 = vpop.f32.mrf.mxu0  ;;  %821 = vmatpush1.msra.mxu1 %v1939_v3  ;;  %v2271_v63 = vpop.f32.mrf.mxu1 }
  0xe7   :  { %982 = vmatprep.subr.mxu0 %v2215_v40  ;;  %822 = vmatprep.subr.mxu1 %v1939_v3  ;;  %v2269_v61 = vadd.f32 %v599_v45, %v2149_v47  ;;  %v2337_v23 = vmax.f32 %v711_v35, %v712_v15  ;;  %v1520_v45 = vld [vmem:[%s2605_s5] sm:$0xff] }
  0xe8   :  { %v2236_v52 = vpop.f32.mrf.mxu0  ;;  %983 = vmatpush1.msra.mxu0 %v2218_v44  ;;  %823 = vmatpush1.msra.mxu1 %v1939_v3  ;;  %v678_v6 = vpop.f32.mrf.mxu1 }
  0xe9   :  { %984 = vmatprep.subr.mxu0 %v2228_v48  ;;  %1801 = vmatmul.mubr.msk.f32.vlgmr.msra.gmra.mxu1 %vm779_vm1, %v2224_v46  ;;  %v699_v5 = vmax.f32 %v2269_v61, 0.0 }
  0xea   :  { %v605_v56 = vpop.f32.mrf.mxu0  ;;  %985 = vmatpush1.msra.mxu0 %v2232_v49  ;;  %897 = vmatprep.subr.mxu1 %v2234_v50  ;;  %v682_v17 = vpop.f32.mrf.mxu1 }
  0xeb   :  { %v2252_v58 = vadd.f32 %v605_v56, %v2147_v41  ;;  %986 = vmatprep.subr.mxu0 %v2234_v50  ;;  %898 = vmatpush1.msra.mxu1 %v2242_v53  ;;  %v2313_v16 = vmax.f32 %v698_v11, %v699_v5  ;;  %v683_v29 = vadd.f32 %v682_v17, %v2147_v41 }
  0xec   :  { %987 = vmatpush1.msra.mxu0 %v2242_v53  ;;  %899 = vmatprep.subr.mxu1 %v2247_v55  ;;  %v607_v28 = vpop.f32.mrf.mxu0 }
  0xed   :  { %988 = vmatprep.subr.mxu0 %v2247_v55  ;;  %861 = vmatprep.mubr.f32.mxu1 %v1939_v3  ;;  %v715_v0 = vmax.f32 %v2252_v58, 0.0  ;;  %v608_v31 = vadd.f32 %v607_v28, %v2147_v41 }
  0xee   :  { %900 = vmatpush1.msra.mxu1 %v2258_v57  ;;  %989 = vmatpush1.msra.mxu0 %v2258_v57 }
  0xef   :  { %1802 = vmatmul.mubr.msk.f32.gmra.mxu1 %vm779_vm1, %v2266_v60  ;;  %901 = vmatprep.subr.mxu1 %v2169_v7  ;;  %v2302_v13 = vmax.f32 %v714_v1, %v715_v0  ;;  %v716_v36 = vmax.f32 %v608_v31, 0.0 }
  0xf0   :  { %990 = vmatprep.subr.mxu0 %v2169_v7  ;;  %902 = vmatpush1.msra.mxu1 %v2171_v9  ;;  %v713_v7 = vmax.f32 %v529_v51, 0.0 }
  0xf1   :  { %991 = vmatpush1.msra.mxu0 %v2171_v9  ;;  %903 = vmatprep.subr.mxu1 %v2175_v12  ;;  %v747_v42 = vmax.f32 %v715_v0, %v716_v36 }
  0xf2   :  { %992 = vmatprep.subr.mxu0 %v2175_v12  ;;  %866 = vmatprep.mubr.f32.mxu1 %v1939_v3  ;;  %v2306_v9 = vmax.f32 %v713_v7, %v714_v1  ;;  %v697_v12 = vmax.f32 %v523_v2, 0.0  ;;  %v2331_v20 = vmax.f32 %v712_v15, %v713_v7 }
  0xf3   :  { %904 = vmatpush1.msra.mxu1 %v2180_v14  ;;  %993 = vmatpush1.msra.mxu0 %v2180_v14  ;;  %v696_v14 = vmax.f32 %v448_v10, 0.0 }
  0xf4   :  { %1803 = vmatmul.mubr.msk.f32.gmra.mxu1 %vm779_vm1, %v2294_v8  ;;  %905 = vmatprep.subr.mxu1 %v2186_v19  ;;  %v2320_v18 = vmax.f32 %v697_v12, %v698_v11  ;;  %v2327_v19 = vld [vmem:[%s2604_s3 + $0x18] sm:$0xff] }
  0xf5   :  { %1809 = vmatmul.mubr.msk.f32.vlgmr.msra.gmra.mxu0 %vm779_vm1, %v2224_v46  ;;  %1152 = vmatprep.subr.mxu0 %v2302_v13  ;;  %v2343_v24 = vmax.f32 %v696_v14, %v697_v12  ;;  %v2349_v25 = vmax.f32 %v695_v34, %v696_v14  ;;  %v717_v34 = vmax.f32 %v683_v29, 0.0 }
  0xf6   :  { %906 = vmatpush1.msra.mxu1 %v2193_v22  ;;  %1153 = vmatpush1.msra.mxu0 %v2306_v9  ;;  %v684_v22 = vpop.f32.mrf.mxu1 }
  0xf7   :  { %907 = vmatprep.subr.mxu1 %v2199_v27  ;;  %1154 = vmatprep.subr.mxu0 %v2313_v16  ;;  %v685_v26 = vadd.f32 %v684_v22, %v2147_v41  ;;  %v679_v27 = vadd.f32 %v678_v6, %v2149_v47  ;;  %v602_v41 = vadd.f32 %v2236_v52, %v2149_v47 }
  0xf8   :  { %871 = vmatprep.mubr.f32.mxu1 %v1939_v3  ;;  %908 = vmatpush1.msra.mxu1 %v2205_v30  ;;  %v677_v30 = vadd.f32 %v2271_v63, %v2149_v47 }
  0xf9   :  { %1031 = vmatprep.mubr.f32.mxu0 %v1939_v3  ;;  %1155 = vmatpush1.msra.mxu0 %v2320_v18  ;;  %v718_v21 = vmax.f32 %v685_v26, 0.0  ;;  %v702_v33 = vmax.f32 %v679_v27, 0.0  ;;  %v700_v47 = vmax.f32 %v602_v41, 0.0 }
  0xfa   :  { %1804 = vmatmul.mubr.msk.f32.gmra.mxu1 %vm779_vm1, %v2327_v19  ;;  %1810 = vmatmul.mubr.msk.f32.gmra.mxu0 %vm779_vm1, %v2266_v60  ;;  %v701_v35 = vmax.f32 %v677_v30, 0.0 }
  0xfb   :  { %1067 = vmatprep.subr.mxu1 %v2331_v20  ;;  %1156 = vmatprep.subr.mxu0 %v2331_v20  ;;  %v2375_v32 = vmax.f32 %v718_v21, 0.0  ;;  %v749_v37 = vmax.f32 %v717_v34, %v718_v21  ;;  %v734_v38 = vmax.f32 %v702_v33, 0.0 }
  0xfc   :  { %1157 = vmatpush1.msra.mxu0 %v2337_v23  ;;  %941 = vmatprep.mubr.f32.mxu1 %v1939_v3  ;;  %v733_v39 = vmax.f32 %v701_v35, %v702_v33  ;;  %v732_v43 = vmax.f32 %v700_v47, %v701_v35 }
  0xfd   :  { %1158 = vmatprep.subr.mxu0 %v2343_v24  ;;  %1036 = vmatprep.mubr.f32.mxu0 %v1939_v3 }
  0xfe   :  { %1159 = vmatpush1.msra.mxu0 %v2349_v25  ;;  %1805 = vmatmul.mubr.msk.f32.vlgmr.msra.gmra.mxu1 %vm779_vm1, %v2224_v46 }
  0xff   :  { %1811 = vmatmul.mubr.msk.f32.gmra.mxu0 %vm779_vm1, %v2294_v8  ;;  %1068 = vmatpush1.msra.mxu1 %v2337_v23 }
 0x100   :  { %1160 = vmatprep.subr.mxu0 %v2215_v40  ;;  %1069 = vmatprep.subr.mxu1 %v2343_v24 }
 0x101   :  { %1161 = vmatpush1.msra.mxu0 %v2218_v44  ;;  %1070 = vmatpush1.msra.mxu1 %v2349_v25 }
 0x102   :  { %1162 = vmatprep.subr.mxu0 %v2228_v48  ;;  %946 = vmatprep.mubr.f32.mxu1 %v1939_v3 }
 0x103   :  { %1041 = vmatprep.mubr.f32.mxu0 %v1939_v3  ;;  %1071 = vmatprep.subr.mxu1 %v2215_v40  ;;  %v748_v40 = vmax.f32 %v716_v36, %v717_v34 }
 0x104   :  { %1163 = vmatpush1.msra.mxu0 %v2232_v49  ;;  %1806 = vmatmul.mubr.msk.f32.gmra.mxu1 %vm779_vm1, %v2266_v60 }
 0x105   :  { %1812 = vmatmul.mubr.msk.f32.gmra.mxu0 %vm779_vm1, %v2327_v19  ;;  %1072 = vmatpush1.msra.mxu1 %v2218_v44  ;;  %v731_v44 = vmax.f32 %v699_v5, %v700_v47 }
 0x106   :  { %1322 = vmatprep.subr.mxu0 %v2375_v32  ;;  %1073 = vmatprep.subr.mxu1 %v2228_v48 }
 0x107   :  { %1074 = vmatpush1.msra.mxu1 %v2232_v49  ;;  %951 = vmatprep.mubr.f32.mxu1 %v1939_v3  ;;  %v2479_v49 = vpop.permute.xlu1 %776 }
 0x108   :  { %1075 = vmatprep.subr.mxu1 %v2234_v50  ;;  %1196 = vmatprep.mubr.f32.mxu0 %v1939_v3 }
 0x109   :  { %1807 = vmatmul.mubr.msk.f32.gmra.mxu1 %vm779_vm1, %v2294_v8  ;;  %1817 = vmatmul.mubr.msk.f32.vlgmr.msra.gmra.mxu0 %vm779_vm1, %v2224_v46 }
 0x10a   :  { %1076 = vmatpush1.msra.mxu1 %v2242_v53  ;;  %1323 = vmatpush1.msra.mxu0 %v749_v37 }
 0x10b   :  { %1077 = vmatprep.subr.mxu1 %v2247_v55  ;;  %1324 = vmatprep.subr.mxu0 %v734_v38  ;;  %v2481_v53 = vpop.permute.xlu1 %771 }
 0x10c   :  { %1078 = vmatpush1.msra.mxu1 %v2258_v57  ;;  %1325 = vmatpush1.msra.mxu0 %v733_v39 }
 0x10d   :  { %956 = vmatprep.mubr.f32.mxu1 %v1939_v3  ;;  %1201 = vmatprep.mubr.f32.mxu0 %v1939_v3 }
 0x10e   :  { %1237 = vmatprep.subr.mxu1 %v748_v40  ;;  %1326 = vmatprep.subr.mxu0 %v748_v40 }
 0x10f   :  { %1808 = vmatmul.mubr.msk.f32.gmra.mxu1 %vm779_vm1, %v2327_v19  ;;  %1818 = vmatmul.mubr.msk.f32.gmra.mxu0 %vm779_vm1, %v2266_v60  ;;  %v2483_v57 = vpop.permute.xlu1 %761 }
 0x110   :  { %1327 = vmatpush1.msra.mxu0 %v747_v42  ;;  %1111 = vmatprep.mubr.f32.mxu1 %v1939_v3 }
 0x111   :  { %1328 = vmatprep.subr.mxu0 %v732_v43  ;;  %1206 = vmatprep.mubr.f32.mxu0 %v1939_v3 }
 0x112   :  { %1329 = vmatpush1.msra.mxu0 %v731_v44 }
 0x113   :  { %1330 = vmatprep.subr.mxu0 %v2302_v13  ;;  %1813 = vmatmul.mubr.msk.f32.vlgmr.msra.gmra.mxu1 %vm779_vm1, %v2224_v46 }
 0x114   :  { %1819 = vmatmul.mubr.msk.f32.gmra.mxu0 %vm779_vm1, %v2294_v8  ;;  %1238 = vmatpush1.msra.mxu1 %v747_v42 }
 0x115   :  { %1331 = vmatpush1.msra.mxu0 %v2306_v9  ;;  %1239 = vmatprep.subr.mxu1 %v732_v43 }
 0x116   :  { %1332 = vmatprep.subr.mxu0 %v2313_v16  ;;  %1240 = vmatpush1.msra.mxu1 %v731_v44 }
 0x117   :  { %1333 = vmatpush1.msra.mxu0 %v2320_v18  ;;  %1116 = vmatprep.mubr.f32.mxu1 %v1939_v3 }
 0x118   :  { %1211 = vmatprep.mubr.f32.mxu0 %v1939_v3  ;;  %1241 = vmatprep.subr.mxu1 %v2302_v13 }
 0x119   :  { %1814 = vmatmul.mubr.msk.f32.gmra.mxu1 %vm779_vm1, %v2266_v60  ;;  %1820 = vmatmul.mubr.msk.f32.gmra.mxu0 %vm779_vm1, %v2327_v19 }
 0x11a   :  { %1242 = vmatpush1.msra.mxu1 %v2306_v9  ;;  %1121 = vmatprep.mubr.f32.mxu1 %v1939_v3 }
 0x11b   :  { %1243 = vmatprep.subr.mxu1 %v2313_v16  ;;  %1366 = vmatprep.mubr.f32.mxu0 %v1939_v3 }
 0x11c   :  { %1244 = vmatpush1.msra.mxu1 %v2320_v18 }
 0x11d   :  { %1245 = vmatprep.subr.mxu1 %v2331_v20  ;;  %1815 = vmatmul.mubr.msk.f32.gmra.mxu1 %vm779_vm1, %v2294_v8 }
 0x11e   :  { %1246 = vmatpush1.msra.mxu1 %v2337_v23  ;;  %1825 = vmatmul.mubr.msk.f32.vlgmr.msra.gmra.mxu0 %vm779_vm1, %v2224_v46 }
 0x11f   :  { %1247 = vmatprep.subr.mxu1 %v2343_v24  ;;  %1126 = vmatprep.mubr.f32.mxu1 %v1939_v3 }
 0x120   :  { %1248 = vmatpush1.msra.mxu1 %v2349_v25  ;;  %1371 = vmatprep.mubr.f32.mxu0 %v1939_v3 }
 0x121   :  { %1411 = vmatprep.subr.mxu1 %v2375_v32  ;;  %1816 = vmatmul.mubr.msk.f32.gmra.mxu1 %vm779_vm1, %v2327_v19 }
 0x122   :  { %1826 = vmatmul.mubr.msk.f32.gmra.mxu0 %vm779_vm1, %v2266_v60  ;;  %1281 = vmatprep.mubr.f32.mxu1 %v1939_v3 }
 0x123   :  { %1376 = vmatprep.mubr.f32.mxu0 %v1939_v3 }
 0x125   :  { %1821 = vmatmul.mubr.msk.f32.vlgmr.msra.gmra.mxu1 %vm779_vm1, %v2224_v46 }
 0x126   :  { %1412 = vmatpush1.msra.mxu1 %v749_v37  ;;  %1286 = vmatprep.mubr.f32.mxu1 %v1939_v3 }
 0x127   :  { %1413 = vmatprep.subr.mxu1 %v734_v38  ;;  %1827 = vmatmul.mubr.msk.f32.gmra.mxu0 %vm779_vm1, %v2294_v8 }
 0x128   :  { %1414 = vmatpush1.msra.mxu1 %v733_v39  ;;  %1381 = vmatprep.mubr.f32.mxu0 %v1939_v3 }
 0x129   :  { %1415 = vmatprep.subr.mxu1 %v748_v40  ;;  %1822 = vmatmul.mubr.msk.f32.gmra.mxu1 %vm779_vm1, %v2266_v60 }
 0x12a   :  { %1416 = vmatpush1.msra.mxu1 %v747_v42  ;;  %1291 = vmatprep.mubr.f32.mxu1 %v1939_v3 }
 0x12b   :  { %1417 = vmatprep.subr.mxu1 %v732_v43  ;;  %1828 = vmatmul.mubr.msk.f32.gmra.mxu0 %vm779_vm1, %v2327_v19 }
 0x12c   :  { %1418 = vmatpush1.msra.mxu1 %v731_v44  ;;  %1899 = vmatprep.mubr.f32.mxu0 %v1520_v45 }
 0x12d   :  { %1823 = vmatmul.mubr.msk.f32.gmra.mxu1 %vm779_vm1, %v2294_v8  ;;  %1911 = vmatprep.subr.mxu1 %v1939_v3 }
 0x12e   :  { %1296 = vmatprep.mubr.f32.mxu1 %v1939_v3 }
 0x131   :  { %1824 = vmatmul.mubr.msk.f32.gmra.mxu1 %vm779_vm1, %v2327_v19 }
 0x132   :  { %1451 = vmatprep.mubr.f32.mxu1 %v1939_v3 }
 0x135   :  { %1829 = vmatmul.mubr.msk.f32.vlgmr.msra.gmra.mxu1 %vm779_vm1, %v2224_v46 }
 0x136   :  { %1456 = vmatprep.mubr.f32.mxu1 %v1939_v3 }
 0x139   :  { %1830 = vmatmul.mubr.msk.f32.gmra.mxu1 %vm779_vm1, %v2266_v60 }
 0x13a   :  { %1461 = vmatprep.mubr.f32.mxu1 %v1939_v3 }
 0x13d   :  { %1831 = vmatmul.mubr.msk.f32.gmra.mxu1 %vm779_vm1, %v2294_v8  ;;  %v2491_v8 = vpop.permute.xlu0 %766 }
 0x13e   :  { %1466 = vmatprep.mubr.f32.mxu1 %v1939_v3 }
 0x141   :  { %1832 = vmatmul.mubr.msk.f32.gmra.mxu1 %vm779_vm1, %v2327_v19 }
 0x142   :  { %1927 = vmatprep.mubr.msk.f32.mxu1 %vm1941_vm2, %v1939_v3 }
 0x1a9   :  { %v858_v46 = vpop.f32.mrf.mxu1 }
 0x1aa   :  { %v859_v51 = vadd.f32 %v858_v46, %v2483_v57 }
 0x1ab   :  { %v860_v48 = vpop.f32.mrf.mxu1 }
 0x1ac   :  { %v1472_v4 = vmax.f32 %v859_v51, 0.0 }
 0x1af   :  { %v863_v50 = vpop.f32.mrf.mxu1 }
 0x1b0   :  { %v864_v7 = vadd.f32 %v863_v50, %v2491_v8 }
 0x1b1   :  { %v865_v52 = vpop.f32.mrf.mxu1 }
 0x1b2   :  { %v1480_v15 = vmax.f32 %v864_v7, 0.0 }
 0x1b4   :  { %v868_v54 = vpop.f32.mrf.mxu1 }
 0x1b5   :  { %v1028_v55 = vpop.f32.mrf.mxu0  ;;  %v869_v14 = vadd.f32 %v868_v54, %v2481_v53 }
 0x1b6   :  { %v870_v56 = vpop.f32.mrf.mxu1  ;;  %v1029_v30 = vadd.f32 %v1028_v55, %v2483_v57 }
 0x1b7   :  { %v1030_v58 = vpop.f32.mrf.mxu0  ;;  %v1488_v25 = vmax.f32 %v869_v14, 0.0 }
 0x1b8   :  { %v1474_v36 = vmax.f32 %v1029_v30, 0.0 }
 0x1ba   :  { %v873_v59 = vpop.f32.mrf.mxu1  ;;  %v2485_v60 = vpop.f32.mrf.mxu0 }
 0x1bb   :  { %v874_v21 = vadd.f32 %v873_v59, %v2479_v49 }
 0x1bc   :  { %v875_v61 = vpop.f32.mrf.mxu1  ;;  %v1035_v63 = vpop.f32.mrf.mxu0 }
 0x1bd   :  { %v1496_v34 = vmax.f32 %v874_v21, 0.0 }
 0x1be   :  { %v943_v62 = vpop.f32.mrf.mxu1 }
 0x1bf   :  { %v944_v0 = vadd.f32 %v943_v62, %v2483_v57  ;;  %v2489_v1 = vpop.f32.mrf.mxu0 }
 0x1c0   :  { %v945_v2 = vpop.f32.mrf.mxu1 }
 0x1c1   :  { %v1473_v5 = vmax.f32 %v944_v0, 0.0  ;;  %v1040_v6 = vpop.f32.mrf.mxu0 }
 0x1c3   :  { %v2494_v10 = vmax.f32 %v1472_v4, %v1473_v5 }
 0x1c4   :  { %v948_v11 = vpop.f32.mrf.mxu1 }
 0x1c5   :  { %v949_v13 = vadd.f32 %v948_v11, %v2491_v8  ;;  %v2497_v9 = vpop.f32.mrf.mxu0 }
 0x1c6   :  { %v950_v12 = vpop.f32.mrf.mxu1 }
 0x1c7   :  { %v1481_v16 = vmax.f32 %v949_v13, 0.0  ;;  %v1045_v17 = vpop.f32.mrf.mxu0 }
 0x1c9   :  { %v2500_v18 = vmax.f32 %v1480_v15, %v1481_v16  ;;  %v953_v19 = vpop.f32.mrf.mxu1  ;;  %v2502_v20 = vpop.f32.mrf.mxu0 }
 0x1ca   :  { %v954_v22 = vadd.f32 %v953_v19, %v2481_v53 }
 0x1cb   :  { %v955_v23 = vpop.f32.mrf.mxu1  ;;  %v1200_v24 = vpop.f32.mrf.mxu0 }
 0x1cc   :  { %v1489_v26 = vmax.f32 %v954_v22, 0.0 }
 0x1ce   :  { %v2506_v27 = vmax.f32 %v1488_v25, %v1489_v26 }
 0x1cf   :  { %v958_v28 = vpop.f32.mrf.mxu1  ;;  %v2508_v29 = vpop.f32.mrf.mxu0 }
 0x1d0   :  { %v959_v31 = vadd.f32 %v958_v28, %v2479_v49 }
 0x1d1   :  { %v960_v32 = vpop.f32.mrf.mxu1  ;;  %v1205_v33 = vpop.f32.mrf.mxu0 }
 0x1d2   :  { %v1497_v41 = vmax.f32 %v959_v31, 0.0 }
 0x1d3   :  { %v1113_v35 = vpop.f32.mrf.mxu1 }
 0x1d4   :  { %v2512_v37 = vmax.f32 %v1496_v34, %v1497_v41  ;;  %v1114_v38 = vadd.f32 %v1113_v35, %v2483_v57  ;;  %v1208_v39 = vpop.f32.mrf.mxu0 }
 0x1d5   :  { %v1115_v47 = vpop.f32.mrf.mxu1 }
 0x1d6   :  { %v1475_v40 = vmax.f32 %v1114_v38, 0.0  ;;  %v1210_v42 = vpop.f32.mrf.mxu0 }
 0x1d8   :  { %v2515_v43 = vmax.f32 %v1474_v36, %v1475_v40 }
 0x1d9   :  { %v2517_v44 = vpop.f32.mrf.mxu1  ;;  %v1213_v45 = vpop.f32.mrf.mxu0 }
 0x1da   :  { %v1214_v38 = vadd.f32 %v1213_v45, %v2479_v49  ;;  %v1199_v45 = vadd.f32 %v2502_v20, %v2483_v57  ;;  %v1039_v20 = vadd.f32 %v2489_v1, %v2481_v53  ;;  %v1034_v1 = vadd.f32 %v2485_v60, %v2491_v8  ;;  %v1521_v60 = vld [vmem:[%s2605_s5 + $0x8] sm:$0xff] }
 0x1db   :  { %v1120_v46 = vpop.f32.mrf.mxu1  ;;  %v1215_v48 = vpop.f32.mrf.mxu0 }
 0x1dc   :  { %v1209_v46 = vadd.f32 %v1208_v39, %v2481_v53  ;;  %v1204_v39 = vadd.f32 %v2508_v29, %v2491_v8  ;;  %v1476_v29 = vmax.f32 %v1199_v45, 0.0 }
 0x1dd   :  { %v2519_v50 = vpop.f32.mrf.mxu1 }
 0x1de   :  { %v1368_v52 = vpop.f32.mrf.mxu0 }
 0x1df   :  { %v1125_v54 = vpop.f32.mrf.mxu1  ;;  %v1369_v30 = vadd.f32 %v1368_v52, %v2483_v57 }
 0x1e0   :  { %v1370_v55 = vpop.f32.mrf.mxu0 }
 0x1e1   :  { %v2521_v56 = vpop.f32.mrf.mxu1  ;;  %v1478_v48 = vmax.f32 %v1369_v30, 0.0 }
 0x1e2   :  { %v1373_v58 = vpop.f32.mrf.mxu0 }
 0x1e3   :  { %v1130_v59 = vpop.f32.mrf.mxu1  ;;  %v1374_v31 = vadd.f32 %v1373_v58, %v2491_v8 }
 0x1e4   :  { %v1375_v61 = vpop.f32.mrf.mxu0  ;;  %v1500_v59 = vmax.f32 %v1214_v38, 0.0 }
 0x1e5   :  { %v1283_v63 = vpop.f32.mrf.mxu1  ;;  %v1486_v54 = vmax.f32 %v1374_v31, 0.0 }
 0x1e7   :  { %v1285_v51 = vpop.f32.mrf.mxu1  ;;  %v1378_v62 = vpop.f32.mrf.mxu0 }
 0x1e8   :  { %v1379_v22 = vadd.f32 %v1378_v62, %v2481_v53 }
 0x1e9   :  { %v1288_v0 = vpop.f32.mrf.mxu1  ;;  %v1380_v2 = vpop.f32.mrf.mxu0 }
 0x1ea   :  { %v1494_v32 = vmax.f32 %v1379_v22, 0.0  ;;  %v1289_v61 = vadd.f32 %v1288_v0, %v2491_v8  ;;  %v1492_v2 = vmax.f32 %v1209_v46, 0.0  ;;  %v1044_v0 = vadd.f32 %v2497_v9, %v2479_v49 }
 0x1eb   :  { %v1290_v4 = vpop.f32.mrf.mxu1  ;;  %v1383_v5 = vpop.f32.mrf.mxu0  ;;  %v1482_v22 = vmax.f32 %v1034_v1, 0.0 }
 0x1ec   :  { %v1384_v25 = vadd.f32 %v1383_v5, %v2479_v49  ;;  %v1284_v4 = vadd.f32 %v1283_v63, %v2483_v57  ;;  %v1498_v9 = vmax.f32 %v1044_v0, 0.0  ;;  %v1696_v0 = vlaneseq }
 0x1ed   :  { %v1293_v6 = vpop.f32.mrf.mxu1  ;;  %v1385_v7 = vpop.f32.mrf.mxu0 }
 0x1ee   :  { %v1502_v35 = vmax.f32 %v1384_v25, 0.0  ;;  %v1294_v52 = vadd.f32 %v1293_v6, %v2481_v53  ;;  %v1129_v7 = vadd.f32 %v2521_v56, %v2479_v49  ;;  %v1477_v63 = vmax.f32 %v1284_v4, 0.0 }
 0x1ef   :  { %v1295_v11 = vpop.f32.mrf.mxu1 }
 0x1f0   :  { %v1493_v5 = vmax.f32 %v1294_v52, 0.0  ;;  %v1485_v11 = vmax.f32 %v1289_v61, 0.0  ;;  %v1499_v56 = vmax.f32 %v1129_v7, 0.0  ;;  %v1697_v7 = vshrl.u32 %v1696_v0, 7 }
 0x1f1   :  { %v1298_v13 = vpop.f32.mrf.mxu1 }
 0x1f2   :  { %v1299_v47 = vadd.f32 %v1298_v13, %v2479_v49 }
 0x1f3   :  { %v1300_v12 = vpop.f32.mrf.mxu1 }
 0x1f4   :  { %v1501_v51 = vmax.f32 %v1299_v47, 0.0  ;;  %v1484_v12 = vmax.f32 %v1204_v39, 0.0 }
 0x1f5   :  { %v1453_v15 = vpop.f32.mrf.mxu1 }
 0x1f6   :  { %v1454_v34 = vadd.f32 %v1453_v15, %v2483_v57  ;;  %v1518_v13 = vmax.f32 %v1500_v59, %v1501_v51  ;;  %v1124_v57 = vadd.f32 %v2519_v50, %v2481_v53  ;;  %v1514_v15 = vmax.f32 %v1492_v2, %v1493_v5 }
 0x1f7   :  { %v1455_v16 = vpop.f32.mrf.mxu1  ;;  %v1517_v50 = vmax.f32 %v1498_v9, %v1499_v56 }
 0x1f8   :  { %v1479_v55 = vmax.f32 %v1454_v34, 0.0  ;;  %v1510_v16 = vmax.f32 %v1484_v12, %v1485_v11  ;;  %v1698_v11 = vsub.s32 0, %v1697_v7 }
 0x1f9   :  { %v1458_v17 = vpop.f32.mrf.mxu1 }
 0x1fa   :  { %v1459_v21 = vadd.f32 %v1458_v17, %v2491_v8  ;;  %v1507_v6 = vmax.f32 %v1478_v48, %v1479_v55  ;;  %v1490_v17 = vmax.f32 %v1039_v20, 0.0 }
 0x1fb   :  { %v1460_v14 = vpop.f32.mrf.mxu1 }
 0x1fc   :  { %v1487_v40 = vmax.f32 %v1459_v21, 0.0  ;;  %v1491_v14 = vmax.f32 %v1124_v57, 0.0 }
 0x1fd   :  { %v1463_v19 = vpop.f32.mrf.mxu1 }
 0x1fe   :  { %v1464_v24 = vadd.f32 %v1463_v19, %v2481_v53  ;;  %v1511_v62 = vmax.f32 %v1486_v54, %v1487_v40  ;;  %v1506_v19 = vmax.f32 %v1476_v29, %v1477_v63 }
 0x1ff   :  { %v1465_v23 = vpop.f32.mrf.mxu1 }
 0x200   :  { %v1495_v41 = vmax.f32 %v1464_v24, 0.0  ;;  %v1513_v23 = vmax.f32 %v1490_v17, %v1491_v14 }
 0x201   :  { %v1468_v26 = vpop.f32.mrf.mxu1 }
 0x202   :  { %v1469_v28 = vadd.f32 %v1468_v26, %v2479_v49  ;;  %v1515_v58 = vmax.f32 %v1494_v32, %v1495_v41  ;;  %v1119_v49 = vadd.f32 %v2517_v44, %v2491_v8  ;;  %v1522_v8 = vld [vmem:[%s2605_s5 + $0x10] sm:$0xff]  ;;  %v1574_v26 = vpop.permute.xlu0 %1573 }
 0x203   :  { %v1470_v33 = vpop.f32.mrf.mxu1 }
 0x204   :  { %v1503_v36 = vmax.f32 %v1469_v28, 0.0  ;;  %v1483_v53 = vmax.f32 %v1119_v49, 0.0  ;;  %v1569_v28 = vpop.permute.xlu1 %1568 }
 0x206   :  { %v1519_v42 = vmax.f32 %v1502_v35, %v1503_v36  ;;  %v1509_v44 = vmax.f32 %v1482_v22, %v1483_v53  ;;  %v1564_v32 = vpop.permute.xlu0 %1563 }
 0x208   :  { %1867 = vmatprep.subr.mxu0 %v1519_v42  ;;  %v1559_v34 = vpop.permute.xlu1 %1558 }
 0x209   :  { %1868 = vmatpush3.msra.mxu0 %v1519_v42 }
 0x20a   :  { %1869 = vmatprep.subr.mxu0 %v1515_v58  ;;  %v1554_v42 = vpop.permute.xlu0 %1553 }
 0x20b   :  { %1870 = vmatpush3.msra.mxu0 %v1515_v58 }
 0x20c   :  { %1871 = vmatprep.subr.mxu0 %v1511_v62  ;;  %v1549_v54 = vpop.permute.xlu1 %1548 }
 0x20d   :  { %1872 = vmatpush3.msra.mxu0 %v1511_v62 }
 0x20e   :  { %1873 = vmatprep.subr.mxu0 %v1507_v6  ;;  %v1544_v61 = vpop.permute.xlu0 %1543 }
 0x20f   :  { %1874 = vmatpush3.msra.mxu0 %v1507_v6  ;;  %v1689_v6 = vld [vmem:[%s2606_s7] sm:$0x1] }
 0x210   :  { %1875 = vmatprep.subr.mxu0 %v1518_v13  ;;  %v1539_v45 = vpop.permute.xlu1 %1538 }
 0x211   :  { %1876 = vmatpush3.msra.mxu0 %v1518_v13 }
 0x212   :  { %1877 = vmatprep.subr.mxu0 %v1514_v15  ;;  %v1694_v13 = vpop.permute.xlu0 %1693 }
 0x213   :  { %1878 = vmatpush3.msra.mxu0 %v1514_v15  ;;  %v1699_v20 = vrot.slane %v1694_v13, %v1698_v11 }
 0x214   :  { %1879 = vmatprep.subr.mxu0 %v1510_v16 }
 0x215   :  { %1880 = vmatpush3.msra.mxu0 %v1510_v16 }
 0x216   :  { %1881 = vmatprep.subr.mxu0 %v1506_v19 }
 0x217   :  { %1882 = vmatpush3.msra.mxu0 %v1506_v19 }
 0x218   :  { %1883 = vmatprep.subr.mxu0 %v1517_v50 }
 0x219   :  { %1884 = vmatpush3.msra.mxu0 %v1517_v50 }
 0x21a   :  { %1885 = vmatprep.subr.mxu0 %v1513_v23 }
 0x21b   :  { %1886 = vmatpush3.msra.mxu0 %v1513_v23 }
 0x21c   :  { %1887 = vmatprep.subr.mxu0 %v1509_v44 }
 0x21d   :  { %1888 = vmatpush3.msra.mxu0 %v1509_v44 }
 0x21e   :  { %1889 = vmatprep.subr.mxu0 %v2515_v43 }
 0x21f   :  { %1890 = vmatpush3.msra.mxu0 %v2515_v43  ;;  %v1527_v43 = vld [vmem:[%s2605_s5 + $0x38] sm:$0xff] }
 0x220   :  { %1891 = vmatprep.subr.mxu0 %v2512_v37 }
 0x221   :  { %1892 = vmatpush3.msra.mxu0 %v2512_v37  ;;  %v1525_v37 = vld [vmem:[%s2605_s5 + $0x28] sm:$0xff] }
 0x222   :  { %1893 = vmatprep.subr.mxu0 %v2506_v27 }
 0x223   :  { %1894 = vmatpush3.msra.mxu0 %v2506_v27  ;;  %v1523_v27 = vld [vmem:[%s2605_s5 + $0x18] sm:$0xff] }
 0x224   :  { %1895 = vmatprep.subr.mxu0 %v2500_v18 }
 0x225   :  { %1896 = vmatpush3.msra.mxu0 %v2500_v18  ;;  %v1524_v18 = vld [vmem:[%s2605_s5 + $0x20] sm:$0xff] }
 0x226   :  { %1897 = vmatprep.subr.mxu0 %v2494_v10 }
 0x227   :  { %1898 = vmatpush3.msra.mxu0 %v2494_v10  ;;  %v1526_v10 = vld [vmem:[%s2605_s5 + $0x30] sm:$0xff] }
 0x228   :  { %1900 = vmatmul.mubr.f32.vlgmr.msra.gmra.mxu0 %v1521_v60 }
 0x229   :  { %1902 = vmatprep.mubr.f32.mxu0 %v1522_v8 }
 0x22c   :  { %1903 = vmatmul.mubr.f32.gmra.mxu0 %v1523_v27 }
 0x22d   :  { %1905 = vmatprep.mubr.f32.mxu0 %v1524_v18 }
 0x230   :  { %1906 = vmatmul.mubr.f32.gmra.mxu0 %v1525_v37 }
 0x231   :  { %1908 = vmatprep.mubr.f32.mxu0 %v1526_v10 }
 0x234   :  { %1909 = vmatmul.mubr.f32.gmra.mxu0 %v1527_v43 }
 0x2e8   :  { %v1901_v24 = vpop.f32.mrf.mxu0 }
 0x2e9   :  { %v1648_v51 = vadd.f32 %v1901_v24, %v1544_v61 }
 0x2ea   :  { %v1642_v25 = vpop.f32.mrf.mxu0 }
 0x2eb   :  { %v1643_v39 = vadd.f32 %v1642_v25, %v1539_v45  ;;  %v1682_v4 = vmax.f32 %v1648_v51, 0.0 }
 0x2ec   :  { %v1904_v21 = vpop.f32.mrf.mxu0 }
 0x2ed   :  { %v1658_v52 = vadd.f32 %v1904_v21, %v1554_v42  ;;  %v1681_v5 = vmax.f32 %v1643_v39, 0.0 }
 0x2ee   :  { %v1652_v30 = vpop.f32.mrf.mxu0 }
 0x2ef   :  { %v1653_v58 = vadd.f32 %v1652_v30, %v1549_v54  ;;  %v1684_v62 = vmax.f32 %v1658_v52, 0.0 }
 0x2f0   :  { %v1907_v31 = vpop.f32.mrf.mxu0 }
 0x2f1   :  { %v1668_v38 = vadd.f32 %v1907_v31, %v1564_v32  ;;  %v1683_v2 = vmax.f32 %v1653_v58, 0.0 }
 0x2f2   :  { %v1662_v33 = vpop.f32.mrf.mxu0 }
 0x2f3   :  { %v1663_v46 = vadd.f32 %v1662_v33, %v1559_v34  ;;  %v1686_v55 = vmax.f32 %v1668_v38, 0.0 }
 0x2f4   :  { %v1910_v41 = vpop.f32.mrf.mxu0 }
 0x2f5   :  { %v1678_v35 = vadd.f32 %v1910_v41, %v1574_v26  ;;  %v1685_v59 = vmax.f32 %v1663_v46, 0.0 }
 0x2f6   :  { %v1672_v36 = vpop.f32.mrf.mxu0 }
 0x2f7   :  { %v1688_v47 = vmax.f32 %v1678_v35, 0.0  ;;  %v1673_v40 = vadd.f32 %v1672_v36, %v1569_v28 }
 0x2f9   :  { %v1687_v48 = vmax.f32 %v1673_v40, 0.0  ;;  %1912 = vmatpush3.msra.mxu1 %v1688_v47 }
 0x2fa   :  { %1913 = vmatprep.subr.mxu1 %v1939_v3 }
 0x2fb   :  { %1914 = vmatpush3.msra.mxu1 %v1687_v48 }
 0x2fc   :  { %1915 = vmatprep.subr.mxu1 %v1939_v3 }
 0x2fd   :  { %1916 = vmatpush3.msra.mxu1 %v1686_v55 }
 0x2fe   :  { %1917 = vmatprep.subr.mxu1 %v1939_v3 }
 0x2ff   :  { %1918 = vmatpush3.msra.mxu1 %v1685_v59 }
 0x300   :  { %1919 = vmatprep.subr.mxu1 %v1939_v3 }
 0x301   :  { %1920 = vmatpush3.msra.mxu1 %v1684_v62 }
 0x302   :  { %1921 = vmatprep.subr.mxu1 %v1939_v3 }
 0x303   :  { %1922 = vmatpush3.msra.mxu1 %v1683_v2 }
 0x304   :  { %1923 = vmatprep.subr.mxu1 %v1939_v3 }
 0x305   :  { %1924 = vmatpush3.msra.mxu1 %v1682_v4 }
 0x306   :  { %1925 = vmatprep.subr.mxu1 %v1939_v3 }
 0x307   :  { %1926 = vmatpush3.msra.mxu1 %v1681_v5 }
 0x308   :  { %1928 = vmatmul.mubr.msk.f32.vlgmr.msra.gmra.mxu1 %vm1700_vm3, %v1689_v6 }
 0x3c8   :  { %v1770_v29 = vpop.f32.mrf.mxu1 }
 0x3c9   :  { %v1771_v12 = vadd.f32 %v1770_v29, %v1699_v20 }
 0x3ca   :  { %v1929_v57 = vpop.f32.mrf.mxu1 }
 0x3cb   :  { %v1774_v63 = vsub.f32 0.0, %v1771_v12 }
 0x3cd   :  { %v1775_v15 = vmul.f32 1.442695, %v1774_v63 }
 0x3cf   :  { %1935 = vpow2.f32 %v1775_v15 }
 0x3dc   :  { %v1936_v9 = vpop.eup %1935 }
 0x3dd   :  { %v1777_v49 = vadd.f32 1.0, %v1936_v9 }
 0x3df   :  { %1937 = vrcp.f32 %v1777_v49 }
 0x3ec   :  { %v1938_v56 = vpop.eup %1937 }
 0x3ed   :  { %1780 = vst [vmem:[%s2607_s9] sm:$0x1] %v1938_v56 }

</bundles_post_ra>
